<compile_context>
chip_gen: v6e
topology: v6e:2x2x1
jax: 0.10.0
libtpu: 0.0.40
codegen_flags: <defaults>
</compile_context>

<pallas_src>
import functools

import jax
import jax.numpy as jnp
from jax.experimental import pallas as pl
from jax.experimental.pallas import tpu as pltpu


def _round_up(x, m):
    return ((x + m - 1) // m) * m


def _hw_config():
    """(pipe_budget_bytes, vmem_limit_bytes, prefer_two_d_tiles)."""
    try:
        vmem_cap = pltpu.get_tpu_info().vmem_capacity_bytes
    except Exception:
        vmem_cap = 64 * 1024 * 1024  # conservative: assume v7x-like chip
    if vmem_cap >= 128 * 1024 * 1024:
        # v5e / v6e: 128 MiB physical VMEM, single TensorCore per chip.
        return 64 * 1024 * 1024, 96 * 1024 * 1024, False
    # v7x-like: 64 MiB physical VMEM, 2 TensorCores -> want >= 2 D tiles.
    return 26 * 1024 * 1024, 44 * 1024 * 1024, True


def _choose_tile_d_cap(n, itemsize, pipe_budget):
    # Per-column VMEM cost of one pipelined grid step:
    #   2x double-buffered input + 2x double-buffered output + ~1 f32 temp/elem
    bytes_per_col = n * (2 * itemsize + 2 * itemsize + 4)
    cap = (pipe_budget // max(bytes_per_col, 1)) // 128 * 128
    return int(cap)


# ---------------------------------------------------------------------------
# Single-pass kernel: full batch resident per feature tile.
# ---------------------------------------------------------------------------
def _bn_single_pass_kernel(x_ref, gamma_ref, beta_ref, o_ref, *, eps, inv_n):
    x = x_ref[...].astype(jnp.float32)                             # (N, TILE_D)
    col_sum = jnp.sum(x, axis=0, keepdims=True)                    # (1, TILE_D)
    col_sumsq = jnp.sum(x * x, axis=0, keepdims=True)              # (1, TILE_D)
    mean = col_sum * inv_n
    # Biased variance; clamp against tiny negative values from cancellation.
    var = jnp.maximum(col_sumsq * inv_n - mean * mean, 0.0)
    inv_std = jax.lax.rsqrt(var + eps)                             # EUP rsqrt
    scale = gamma_ref[...].astype(jnp.float32) * inv_std           # (1, TILE_D)
    shift = beta_ref[...].astype(jnp.float32) - mean * scale
    o_ref[...] = (x * scale + shift).astype(o_ref.dtype)


# ---------------------------------------------------------------------------
# Two-pass fallback kernels (very large N): stats+epilogue, then apply.
# ---------------------------------------------------------------------------
def _bn_stats_scale_kernel(x_ref, gamma_ref, beta_ref, scale_ref, shift_ref,
                           sum_sc, sumsq_sc, *, eps, n_true, tile_n):
    ni = pl.program_id(1)

    @pl.when(ni == 0)
    def _():
        sum_sc[...] = jnp.zeros_like(sum_sc)
        sumsq_sc[...] = jnp.zeros_like(sumsq_sc)

    x = x_ref[...].astype(jnp.float32)                             # (tile_n, tile_d)
    # Mask rows past the true batch size (ragged last N tile carries garbage).
    row = jax.lax.broadcasted_iota(jnp.int32, x.shape, 0) + ni * tile_n
    x = jnp.where(row < n_true, x, 0.0)
    sum_sc[...] += jnp.sum(x, axis=0, keepdims=True)
    sumsq_sc[...] += jnp.sum(x * x, axis=0, keepdims=True)

    @pl.when(ni == pl.num_programs(1) - 1)
    def _():
        inv_n = 1.0 / n_true
        mean = sum_sc[...] * inv_n
        var = jnp.maximum(sumsq_sc[...] * inv_n - mean * mean, 0.0)
        inv_std = jax.lax.rsqrt(var + eps)
        scale = gamma_ref[...].astype(jnp.float32) * inv_std
        scale_ref[...] = scale
        shift_ref[...] = beta_ref[...].astype(jnp.float32) - mean * scale


def _bn_apply_kernel(x_ref, scale_ref, shift_ref, o_ref):
    x = x_ref[...].astype(jnp.float32)
    o_ref[...] = (x * scale_ref[...] + shift_ref[...]).astype(o_ref.dtype)


# ---------------------------------------------------------------------------
# Wrappers
# ---------------------------------------------------------------------------
def _batchnorm_single_pass(x, gamma, beta, eps, cap_cols, vmem_limit,
                           prefer_split):
    n, d = x.shape
    d_128 = _round_up(d, 128)
    tile_d = max(128, min(cap_cols, d_128))
    if prefer_split and tile_d >= d_128 and d_128 >= 256:
        # v7x megacore: make sure the "parallel" D axis has >= 2 tiles.
        tile_d = _round_up(d_128 // 2, 128)
    grid_d = pl.cdiv(d, tile_d)

    gamma2d = gamma.astype(jnp.float32).reshape(1, d)
    beta2d = beta.astype(jnp.float32).reshape(1, d)

    kernel = functools.partial(
        _bn_single_pass_kernel, eps=float(eps), inv_n=1.0 / n
    )

    return pl.pallas_call(
        kernel,
        out_shape=jax.ShapeDtypeStruct((n, d), x.dtype),
        grid_spec=pl.GridSpec(
            grid=(grid_d,),
            in_specs=[
                pl.BlockSpec((n, tile_d), lambda j: (0, j)),
                pl.BlockSpec((1, tile_d), lambda j: (0, j)),
                pl.BlockSpec((1, tile_d), lambda j: (0, j)),
            ],
            out_specs=pl.BlockSpec((n, tile_d), lambda j: (0, j)),
        ),
        compiler_params=pltpu.CompilerParams(
            dimension_semantics=("parallel",),
            vmem_limit_bytes=vmem_limit,
        ),
    )(x, gamma2d, beta2d)


def _batchnorm_two_pass(x, gamma, beta, eps, vmem_limit, tiles=None):
    n, d = x.shape
    if tiles is None:
        tile_n = min(1024, _round_up(n, 8))
        tile_d = min(1024, _round_up(d, 128))
    else:
        tile_n = max(8, _round_up(int(tiles[0]), 8))
        tile_d = max(128, _round_up(int(tiles[1]), 128))
    n_tiles = pl.cdiv(n, tile_n)
    d_tiles = pl.cdiv(d, tile_d)

    gamma2d = gamma.astype(jnp.float32).reshape(1, d)
    beta2d = beta.astype(jnp.float32).reshape(1, d)

    stats_kernel = functools.partial(
        _bn_stats_scale_kernel, eps=float(eps), n_true=n, tile_n=tile_n
    )

    # Pass 1: per-column sum / sumsq accumulated across N tiles, with the
    # scale/shift epilogue fused into the last N iteration.
    scale, shift = pl.pallas_call(
        stats_kernel,
        out_shape=(
            jax.ShapeDtypeStruct((1, d), jnp.float32),
            jax.ShapeDtypeStruct((1, d), jnp.float32),
        ),
        grid_spec=pltpu.PrefetchScalarGridSpec(
            num_scalar_prefetch=0,
            grid=(d_tiles, n_tiles),
            in_specs=[
                pl.BlockSpec((tile_n, tile_d), lambda j, i: (i, j)),
                pl.BlockSpec((1, tile_d), lambda j, i: (0, j)),
                pl.BlockSpec((1, tile_d), lambda j, i: (0, j)),
            ],
            out_specs=(
                pl.BlockSpec((1, tile_d), lambda j, i: (0, j)),
                pl.BlockSpec((1, tile_d), lambda j, i: (0, j)),
            ),
            scratch_shapes=[
                pltpu.VMEM((1, tile_d), jnp.float32),
                pltpu.VMEM((1, tile_d), jnp.float32),
            ],
        ),
        compiler_params=pltpu.CompilerParams(
            dimension_semantics=("parallel", "arbitrary"),
            vmem_limit_bytes=vmem_limit,
        ),
    )(x, gamma2d, beta2d)

    # Pass 2: elementwise x * scale + shift, fully parallel tiles.
    out = pl.pallas_call(
        _bn_apply_kernel,
        out_shape=jax.ShapeDtypeStruct((n, d), x.dtype),
        grid_spec=pl.GridSpec(
            grid=(n_tiles, d_tiles),
            in_specs=[
                pl.BlockSpec((tile_n, tile_d), lambda i, j: (i, j)),
                pl.BlockSpec((1, tile_d), lambda i, j: (0, j)),
                pl.BlockSpec((1, tile_d), lambda i, j: (0, j)),
            ],
            out_specs=pl.BlockSpec((tile_n, tile_d), lambda i, j: (i, j)),
        ),
        compiler_params=pltpu.CompilerParams(
            dimension_semantics=("parallel", "parallel"),
            vmem_limit_bytes=vmem_limit,
        ),
    )(x, scale, shift)
    return out


def custom_batchnorm(x, gamma, beta, eps=1e-5, *, tile_d=None,
                     force_two_pass=False, two_pass_tiles=None):
    """Batch-norm forward matching CustomBatchNormAutograd.forward.

    Args:
      x:     (N, D) array
      gamma: (D,) scale parameter
      beta:  (D,) shift parameter
      eps:   stability constant
      tile_d: optional override of the feature-tile width (rounded to 128).
      force_two_pass: force the large-N two-pass fallback (testing hook).
      two_pass_tiles: optional (tile_n, tile_d) override for the fallback.
    Returns:
      (N, D) normalized output, same dtype as x.
    """
    if x.ndim != 2:
        raise ValueError(f"expected 2D input (got {x.ndim}D input)")
    n, d = x.shape
    if gamma.shape != (d,) or beta.shape != (d,):
        raise ValueError("gamma/beta shape mismatch with n_neurons")

    pipe_budget, vmem_limit, prefer_split = _hw_config()
    cap = _choose_tile_d_cap(n, x.dtype.itemsize, pipe_budget)
    if tile_d is not None:
        cap = max(128, (int(tile_d) // 128) * 128)

    if force_two_pass or cap < 128:
        return _batchnorm_two_pass(x, gamma, beta, eps, vmem_limit,
                                   two_pass_tiles)
    return _batchnorm_single_pass(x, gamma, beta, eps, cap, vmem_limit,
                                  prefer_split)


def _reference(x, gamma, beta, eps):
    mean = x.mean(axis=0)
    var = x.var(axis=0)  # jnp.var is biased by default (unbiased=False)
    return gamma * (x - mean) / jnp.sqrt(var + eps) + beta


# TODO(synk): running-mean/var tracking and the autograd backward pass are not
# part of the module's forward() and are not implemented here.

if __name__ == "__main__":
    key = jax.random.PRNGKey(0)
    k0, k1, k2, k3 = jax.random.split(key, 4)

    # --- Small shape consistent with the module: batch=8, n_neurons=32 ------
    n_batch, n_neurons = 8, 32
    x = jax.random.normal(k0, (n_batch, n_neurons), dtype=jnp.float32)
    gamma = jnp.ones((n_neurons,), dtype=jnp.float32)   # matches module init
    beta = jnp.zeros((n_neurons,), dtype=jnp.float32)

    out = jax.block_until_ready(custom_batchnorm(x, gamma, beta, eps=1e-5))
    ref = _reference(x, gamma, beta, 1e-5)
    assert bool(jnp.allclose(out, ref, atol=1e-4, rtol=1e-5)), "single-pass mismatch"

    # --- Exercise the D-tiled pipeline with a ragged last tile --------------
    x2 = jax.random.normal(k1, (64, 384), dtype=jnp.float32)
    gamma2 = 1.0 + 0.1 * jax.random.normal(k2, (384,), dtype=jnp.float32)
    beta2 = 0.1 * jax.random.normal(k3, (384,), dtype=jnp.float32)
    out2 = jax.block_until_ready(
        custom_batchnorm(x2, gamma2, beta2, eps=1e-5, tile_d=256)
    )
    ref2 = _reference(x2, gamma2, beta2, 1e-5)
    assert bool(jnp.allclose(out2, ref2, atol=1e-4, rtol=1e-5)), "tiled mismatch"

    # --- Exercise the large-N two-pass fallback with ragged N and D tiles ---
    x3 = jax.random.normal(k1, (200, 300), dtype=jnp.float32)
    gamma3 = gamma2[:300]
    beta3 = beta2[:300]
    out3 = jax.block_until_ready(
        custom_batchnorm(x3, gamma3, beta3, eps=1e-5, force_two_pass=True,
                         two_pass_tiles=(64, 128))
    )
    ref3 = _reference(x3, gamma3, beta3, 1e-5)
    assert bool(jnp.allclose(out3, ref3, atol=1e-4, rtol=1e-5)), "two-pass mismatch"

    print("KERNEL_OK")
</pallas_src>

<mosaic_0001>
module attributes {stable_mosaic.version = 11 : i64} {
  func.func @_bn_single_pass_kernel(%arg0: i32, %arg1: memref<8x128xf32, #tpu.memory_space<vmem>>, %arg2: memref<1x128xf32, #tpu.memory_space<vmem>>, %arg3: memref<1x128xf32, #tpu.memory_space<vmem>>, %arg4: memref<8x128xf32, #tpu.memory_space<vmem>>) attributes {dimension_semantics = [#tpu.dimension_semantics<parallel>], iteration_bounds = array<i64: 1>, scalar_prefetch = 0 : i64, scratch_operands = 0 : i64, tpu.core_type = #tpu.core_type<tc>, window_params = [{transform_indices = @transform_0, window_bounds = array<i64: 8, 128>}, {transform_indices = @transform_1, window_bounds = array<i64: 1, 128>}, {transform_indices = @transform_2, window_bounds = array<i64: 1, 128>}, {transform_indices = @transform_3, window_bounds = array<i64: 8, 128>}]} {
    %c0 = arith.constant 0 : index
    %c0_0 = arith.constant 0 : index
    %0 = vector.load %arg1[%c0, %c0_0] : memref<8x128xf32, #tpu.memory_space<vmem>>, vector<8x128xf32>
    %cst = arith.constant dense<0.000000e+00> : vector<128xf32>
    %1 = vector.multi_reduction <add>, %0, %cst [0] : vector<8x128xf32> to vector<128xf32>
    %2 = vector.shape_cast %1 : vector<128xf32> to vector<1x128xf32>
    %3 = arith.mulf %0, %0 : vector<8x128xf32>
    %cst_1 = arith.constant dense<0.000000e+00> : vector<128xf32>
    %4 = vector.multi_reduction <add>, %3, %cst_1 [0] : vector<8x128xf32> to vector<128xf32>
    %5 = vector.shape_cast %4 : vector<128xf32> to vector<1x128xf32>
    %cst_2 = arith.constant 1.250000e-01 : f32
    %6 = vector.broadcast %cst_2 : f32 to vector<1x128xf32>
    %7 = arith.mulf %2, %6 : vector<1x128xf32>
    %cst_3 = arith.constant 1.250000e-01 : f32
    %8 = vector.broadcast %cst_3 : f32 to vector<1x128xf32>
    %9 = arith.mulf %5, %8 : vector<1x128xf32>
    %10 = arith.mulf %7, %7 : vector<1x128xf32>
    %11 = arith.subf %9, %10 : vector<1x128xf32>
    %cst_4 = arith.constant 0.000000e+00 : f32
    %12 = vector.broadcast %cst_4 : f32 to vector<1x128xf32>
    %13 = arith.maximumf %11, %12 : vector<1x128xf32>
    %cst_5 = arith.constant 9.99999974E-6 : f32
    %14 = vector.broadcast %cst_5 : f32 to vector<1x128xf32>
    %15 = arith.addf %13, %14 : vector<1x128xf32>
    %16 = math.rsqrt %15 : vector<1x128xf32>
    %c0_6 = arith.constant 0 : index
    %c0_7 = arith.constant 0 : index
    %17 = vector.load %arg2[%c0_6, %c0_7] : memref<1x128xf32, #tpu.memory_space<vmem>>, vector<1x128xf32>
    %18 = arith.mulf %17, %16 : vector<1x128xf32>
    %c0_8 = arith.constant 0 : index
    %c0_9 = arith.constant 0 : index
    %19 = vector.load %arg3[%c0_8, %c0_9] : memref<1x128xf32, #tpu.memory_space<vmem>>, vector<1x128xf32>
    %20 = arith.mulf %7, %18 : vector<1x128xf32>
    %21 = arith.subf %19, %20 : vector<1x128xf32>
    %22 = vector.broadcast %18 : vector<1x128xf32> to vector<8x128xf32>
    %23 = arith.mulf %0, %22 : vector<8x128xf32>
    %24 = vector.broadcast %21 : vector<1x128xf32> to vector<8x128xf32>
    %25 = arith.addf %23, %24 : vector<8x128xf32>
    %c0_10 = arith.constant 0 : index
    %c0_11 = arith.constant 0 : index
    %26 = vector.load %arg4[%c0_10, %c0_11] : memref<8x128xf32, #tpu.memory_space<vmem>>, vector<8x128xf32>
    tpu.vector_store %arg4[%c0_10, %c0_11], %25 {strides = array<i32>} : memref<8x128xf32, #tpu.memory_space<vmem>>, vector<8x128xf32>,
    return
  }
  func.func @transform_0(%arg0: i32) -> (i32, i32) {
    %c0_i32 = arith.constant 0 : i32
    %c0_i32_0 = arith.constant 0 : i32
    return %c0_i32, %arg0 : i32, i32
  }
  func.func @transform_1(%arg0: i32) -> (i32, i32) {
    %c0_i32 = arith.constant 0 : i32
    %c0_i32_0 = arith.constant 0 : i32
    return %c0_i32, %arg0 : i32, i32
  }
  func.func @transform_2(%arg0: i32) -> (i32, i32) {
    %c0_i32 = arith.constant 0 : i32
    %c0_i32_0 = arith.constant 0 : i32
    return %c0_i32, %arg0 : i32, i32
  }
  func.func @transform_3(%arg0: i32) -> (i32, i32) {
    %c0_i32 = arith.constant 0 : i32
    %c0_i32_0 = arith.constant 0 : i32
    return %c0_i32, %arg0 : i32, i32
  }
}

</mosaic_0001>

<bundles_post_ra>
// kernel: tpu_custom_call.1
= control target key start
LH: loop header
LB: loop body
LE: loop exit
PB: predicated region body
PF: predicated region fallthrough
CT: control target
= control target key end

     0   :  { %8 = vsyncpa [#allocation3], 0  ;;  %s165_s0 = inlined_call_operand.hbm [shape: f32[8,32], index: 0, kind: input, shape index: {}]   ;;  %s166_s1 = inlined_call_operand.vmem [shape: f32[1,32], index: 1, kind: input, shape index: {}]   ;;  %s167_s2 = inlined_call_operand.vmem [shape: f32[1,32], index: 2, kind: input, shape index: {}]   ;;  %s168_s3 = inlined_call_operand.hbm [shape: f32[8,32], index: 3, kind: output, shape index: {}]  }
   0x1   :  { %9 = vsyncpa [#allocation4], 0  ;;  %s131_s12 = smov [#allocation2]  }
   0x2   :  { %s16_s13 = sshll.u32 %s131_s12, 4  ;;  %s17_s13 = int_to_ptr.vmem [resolvable:$true] %s16_s13 }
   0x3   :  { %s95_s14 = scalar_lea.vmem %s17_s13, 128  ;;  %p100_p1 = scmp.lt.s32.totalorder %s17_s13, %s17_s13 }
   0x4   :  { %p96_p0 = scmp.ne.s32.totalorder %s17_s13, %s95_s14  ;;  %p101_p2 = scmp.lt.s32.totalorder %s95_s14, %s95_s14 }
   0x6   :  { %p102_p3 = por %p101_p2, %p100_p1 }
   0x8   :  { %p103_p4 = pnand %p102_p3, %p96_p0 }
   0xa   :  { %106 = shalt.err (!%p103_p4)
}
   0xb   :  { %19 = dma.hbm_to_vmem [thread:$0]  %s165_s0, 128, %s17_s13, [#allocation3]  }
   0xc   :  { %127 = dma.done.wait [#allocation3], 128  }
   0xd   :  { %128 = vsyncadd [#allocation3], 4294967168  ;;  %v27_v0 = vld [vmem:[#allocation2] sm:$0xff]  ;;  %v54_v20 = vlaneseq  ;;  %s132_s20 = smov [#allocation5]  }
   0xe   :  { %v28_v1 = vrot.slane %v27_v0, 4  ;;  %v34_v2 = vmul.f32 %v27_v0, %v27_v0  ;;  %v48_v22 = vld [vmem:[%s166_s1] sm:$0x1]  ;;  %s74_s21 = sshll.u32 %s132_s20, 4  ;;  %s75_s21 = int_to_ptr.vmem [resolvable:$true] %s74_s21 }
   0xf   :  { %v55_v21 = vshrl.u32 %v54_v20, 7  ;;  %v50_v26 = vld [vmem:[%s167_s2] sm:$0x1]  ;;  %s107_s22 = scalar_lea.vmem %s75_s21, 128  ;;  %p112_p6 = scmp.lt.s32.totalorder %s75_s21, %s75_s21 }
  0x10   :  { %v29_v3 = vadd.f32 %v28_v1, %v27_v0  ;;  %v35_v4 = vrot.slane %v34_v2, 4  ;;  %p108_p5 = scmp.ne.s32.totalorder %s75_s21, %s107_s22  ;;  %p113_p7 = scmp.lt.s32.totalorder %s107_s22, %s107_s22 }
  0x11   :  { %v56_v23 = vsub.s32 0, %v55_v21 }
  0x12   :  { %v30_v5 = vrot.slane %v29_v3, 2  ;;  %v36_v6 = vadd.f32 %v35_v4, %v34_v2  ;;  %p114_p8 = por %p113_p7, %p112_p6 }
  0x14   :  { %v31_v7 = vadd.f32 %v30_v5, %v29_v3  ;;  %v37_v8 = vrot.slane %v36_v6, 2  ;;  %p115_p9 = pnand %p114_p8, %p108_p5 }
  0x16   :  { %v32_v9 = vrot.slane %v31_v7, 1  ;;  %v38_v10 = vadd.f32 %v37_v8, %v36_v6 }
  0x18   :  { %v33_v11 = vadd.f32 %v32_v9, %v31_v7  ;;  %v39_v12 = vrot.slane %v38_v10, 1 }
  0x1a   :  { %v40_v13 = vadd.f32 %v39_v12, %v38_v10  ;;  %v41_v14 = vmul.f32 0.125, %v33_v11 }
  0x1c   :  { %v42_v15 = vmul.f32 0.125, %v40_v13  ;;  %v43_v16 = vmul.f32 %v41_v14, %v41_v14 }
  0x1e   :  { %v44_v17 = vsub.f32 %v42_v15, %v43_v16 }
  0x20   :  { %v45_v18 = vmax.f32 %v44_v17, 0.0 }
  0x22   :  { %v46_v19 = vadd.f32 1e-05, %v45_v18 }
  0x24   :  { %85 = vrsqrt.f32 %v46_v19 }
  0x31   :  { %v86_v24 = vpop.eup %85 }
  0x32   :  { %v49_v25 = vmul.f32 %v86_v24, %v48_v22 }
  0x34   :  { %v51_v27 = vmul.f32 %v49_v25, %v41_v14  ;;  %v57_v28 = vrot.slane %v49_v25, %v56_v23 }
  0x36   :  { %v52_v29 = vsub.f32 %v50_v26, %v51_v27  ;;  %v59_v30 = vmul.f32 %v57_v28, %v27_v0 }
  0x38   :  { %v64_v31 = vrot.slane %v52_v29, %v56_v23 }
  0x3a   :  { %v66_v32 = vadd.f32 %v64_v31, %v59_v30 }
  0x3c   :  { %67 = vst [vmem:[#allocation5] sm:$0xff] %v66_v32 }
  0x3d   :  { %118 = shalt.err (!%p115_p9)
}
  0x3e   :  { %77 = dma.vmem_to_hbm [thread:$0]  %s75_s21, 128, %s168_s3, [#allocation4]  }
  0x3f   :  { %129 = dma.done.wait [#allocation4], 128  }
  0x40   :  { %130 = vsyncadd [#allocation4], 4294967168 }
  0x41   :  { %81 = vsyncpa [#allocation3], 1 }
  0x42   :  { %82 = vsyncpa [#allocation4], 1 }

</bundles_post_ra>
